<compile_context>
chip_gen: v7x
topology: tpu7x:2x2x1
jax: 0.10.0
libtpu: 0.0.40
codegen_flags: <defaults>
</compile_context>

<pallas_src>
import functools

import jax
import jax.numpy as jnp
from jax.experimental import pallas as pl
from jax.experimental.pallas import tpu as pltpu

HIDDEN1_UNITS = 128
HIDDEN2_UNITS = 64
HIDDEN3_UNITS = 64
HIDDEN4_UNITS = 32
HIDDEN5_UNITS = 32
HIDDEN6_UNITS = 64
HIDDEN7_UNITS = 64
HIDDEN8_UNITS = 8

_HIDDEN = [HIDDEN1_UNITS, HIDDEN2_UNITS, HIDDEN3_UNITS, HIDDEN4_UNITS,
           HIDDEN5_UNITS, HIDDEN6_UNITS, HIDDEN7_UNITS, HIDDEN8_UNITS]

LANE = 128  # all layer out-dims are padded to this lane width


def _round_up(x, m):
    return (x + m - 1) // m * m


def _snet_kernel(x_ref, w_ref, b_ref, out_ref, *, row_offsets, row_sizes):
    """x_ref: [bb, in_pad0]; w_ref: packed weight slab [sum(in_pad_k), 128];
    b_ref: [16, 128] bias slab (rows 0..8 used); out_ref: [bb, 128]."""

    def layer(h, k):
        off, rows = row_offsets[k], row_sizes[k]      # static Python ints
        w = w_ref[off:off + rows, :]                   # static, lane-aligned slice
        b = b_ref[k:k + 1, :]                          # [1, 128] f32 bias row
        return jnp.dot(h.astype(w.dtype), w,
                       preferred_element_type=jnp.float32) + b

    h = x_ref[...]
    h = jnp.maximum(layer(h, 0), 0.0)   # fc1 -> relu
    h = jnp.maximum(layer(h, 1), 0.0)   # fc2 -> relu
    t = layer(h, 2)                     # fc3
    h = t + jnp.maximum(t, 0.0)         # residual: x2 + relu(x2)
    h = jnp.maximum(layer(h, 3), 0.0)   # fc4 -> relu
    h = jnp.maximum(layer(h, 4), 0.0)   # fc5 -> relu
    h = jnp.maximum(layer(h, 5), 0.0)   # fc6 -> relu
    h = jnp.maximum(layer(h, 6), 0.0)   # fc7 -> relu
    h = jnp.maximum(layer(h, 7), 0.0)   # fc8 -> relu
    out_ref[...] = layer(h, 8).astype(out_ref.dtype)   # fc9 (no activation)


def pack_snet_params(params, input_size, *, dtype=jnp.float32):
    """Pack [w1,b1,...,w9,b9] into one zero-padded [sum(in_pad), 128] weight
    slab and a [16, 128] f32 bias slab. Weights are stored as [in, out]."""
    ws = params[0::2]
    bs = params[1::2]
    in_pad0 = _round_up(max(input_size, 1), LANE)
    in_pads = [in_pad0] + [LANE] * 8   # hidden out-dims are all padded to 128

    w_blocks, b_rows, row_offsets = [], [], []
    off = 0
    for k, (w, b) in enumerate(zip(ws, bs)):
        fi, fo = w.shape
        rows = in_pads[k]
        wp = jnp.zeros((rows, LANE), dtype).at[:fi, :fo].set(w.astype(dtype))
        bp = jnp.zeros((LANE,), jnp.float32).at[:fo].set(
            b.reshape(-1).astype(jnp.float32))
        w_blocks.append(wp)
        b_rows.append(bp)
        row_offsets.append(off)
        off += rows

    w_slab = jnp.concatenate(w_blocks, axis=0)
    b_slab = jnp.zeros((16, LANE), jnp.float32).at[:9].set(jnp.stack(b_rows))
    return w_slab, b_slab, tuple(row_offsets), tuple(in_pads)


def snet_forward(x, params, *, block_b=512, use_bf16=False):
    """x: [B, input_size] float32. params: flat list [w1,b1,...,w9,b9] with
    weights stored as [in_features, out_features]."""
    B, input_size = x.shape
    output_size = params[-2].shape[1]
    assert output_size <= LANE and all(h <= LANE for h in _HIDDEN)

    compute_dtype = jnp.bfloat16 if use_bf16 else jnp.float32
    w_slab, b_slab, row_offsets, row_sizes = pack_snet_params(
        params, input_size, dtype=compute_dtype)
    in_pad0 = row_sizes[0]

    # Batch tile: large by default to amortize per-step overhead and feed the
    # MXU full tiles; padded so any caller batch size works.
    bb = _round_up(min(block_b, _round_up(B, 8)), 8)
    B_pad = _round_up(B, bb)
    x_pad = jnp.zeros((B_pad, in_pad0), compute_dtype)
    x_pad = x_pad.at[:B, :input_size].set(x.astype(compute_dtype))

    kernel = functools.partial(
        _snet_kernel, row_offsets=row_offsets, row_sizes=row_sizes)

    out = pl.pallas_call(
        kernel,
        out_shape=jax.ShapeDtypeStruct((B_pad, LANE), jnp.float32),
        grid_spec=pltpu.PrefetchScalarGridSpec(
            num_scalar_prefetch=0,
            grid=(B_pad // bb,),
            in_specs=[
                pl.BlockSpec((bb, in_pad0), lambda i: (i, 0)),
                # constant index_map -> slabs stay resident across the grid
                pl.BlockSpec(w_slab.shape, lambda i: (0, 0)),
                pl.BlockSpec(b_slab.shape, lambda i: (0, 0)),
            ],
            out_specs=pl.BlockSpec((bb, LANE), lambda i: (i, 0)),
        ),
        compiler_params=pltpu.CompilerParams(
            dimension_semantics=("parallel",)),
    )(x_pad, w_slab, b_slab)

    return out[:B, :output_size]


def init_snet_params(key, input_size, output_size):
    """Deterministic PyTorch-Linear-style init; weights stored as [in, out]."""
    dims = [
        (input_size, HIDDEN1_UNITS),
        (HIDDEN1_UNITS, HIDDEN2_UNITS),
        (HIDDEN2_UNITS, HIDDEN3_UNITS),
        (HIDDEN3_UNITS, HIDDEN4_UNITS),
        (HIDDEN4_UNITS, HIDDEN5_UNITS),
        (HIDDEN5_UNITS, HIDDEN6_UNITS),
        (HIDDEN6_UNITS, HIDDEN7_UNITS),
        (HIDDEN7_UNITS, HIDDEN8_UNITS),
        (HIDDEN8_UNITS, output_size),
    ]
    params = []
    for (fan_in, fan_out) in dims:
        key, kw, kb = jax.random.split(key, 3)
        bound = 1.0 / (fan_in ** 0.5)
        w = jax.random.uniform(
            kw, (fan_in, fan_out), jnp.float32, minval=-bound, maxval=bound)
        b = jax.random.uniform(
            kb, (1, fan_out), jnp.float32, minval=-bound, maxval=bound)
        params.extend([w, b])
    return params


def snet_reference(x, params):
    """Pure-JAX reference mirroring the PyTorch forward."""
    ws = params[0::2]
    bs = params[1::2]
    h = jnp.maximum(x @ ws[0] + bs[0], 0.0)
    h = jnp.maximum(h @ ws[1] + bs[1], 0.0)
    t = h @ ws[2] + bs[2]
    h = t + jnp.maximum(t, 0.0)
    h = jnp.maximum(h @ ws[3] + bs[3], 0.0)
    h = jnp.maximum(h @ ws[4] + bs[4], 0.0)
    h = jnp.maximum(h @ ws[5] + bs[5], 0.0)
    h = jnp.maximum(h @ ws[6] + bs[6], 0.0)
    h = jnp.maximum(h @ ws[7] + bs[7], 0.0)
    return h @ ws[8] + bs[8]


if __name__ == "__main__":
    INPUT_SIZE = 32
    OUTPUT_SIZE = 8
    BATCH = 16

    key = jax.random.PRNGKey(0)
    key, kx = jax.random.split(key)
    x = jax.random.normal(kx, (BATCH, INPUT_SIZE), jnp.float32)
    params = init_snet_params(key, INPUT_SIZE, OUTPUT_SIZE)

    # Default config (large block_b, automatically capped/padded to the batch).
    fwd = jax.jit(functools.partial(snet_forward))
    out = jax.block_until_ready(fwd(x, params))
    ref = snet_reference(x, params)
    assert out.shape == (BATCH, OUTPUT_SIZE)
    assert jnp.allclose(out, ref, atol=1e-4, rtol=1e-4)

    # Non-multiple batch + small tile: exercises padding and a multi-step grid.
    key, kx2 = jax.random.split(key)
    x2 = jax.random.normal(kx2, (20, INPUT_SIZE), jnp.float32)
    fwd2 = jax.jit(functools.partial(snet_forward, block_b=8))
    out2 = jax.block_until_ready(fwd2(x2, params))
    ref2 = snet_reference(x2, params)
    assert out2.shape == (20, OUTPUT_SIZE)
    assert jnp.allclose(out2, ref2, atol=1e-4, rtol=1e-4)

    print("KERNEL_OK")
</pallas_src>

<mosaic_0001>
module attributes {stable_mosaic.version = 11 : i64} {
  func.func @_snet_kernel(%arg0: i32, %arg1: memref<16x128xf32, #tpu.memory_space<vmem>>, %arg2: memref<1152x128xf32, #tpu.memory_space<vmem>>, %arg3: memref<16x128xf32, #tpu.memory_space<vmem>>, %arg4: memref<16x128xf32, #tpu.memory_space<vmem>>) attributes {dimension_semantics = [#tpu.dimension_semantics<parallel>], iteration_bounds = array<i64: 1>, scalar_prefetch = 0 : i64, scratch_operands = 0 : i64, tpu.core_type = #tpu.core_type<tc>, window_params = [{transform_indices = @transform_0, window_bounds = array<i64: 16, 128>}, {pipeline_mode = #tpu.pipeline_mode<synchronous>, transform_indices = @transform_1, window_bounds = array<i64: 1152, 128>}, {pipeline_mode = #tpu.pipeline_mode<synchronous>, transform_indices = @transform_2, window_bounds = array<i64: 16, 128>}, {transform_indices = @transform_3, window_bounds = array<i64: 16, 128>}]} {
    %c0 = arith.constant 0 : index
    %c0_0 = arith.constant 0 : index
    %0 = vector.load %arg1[%c0, %c0_0] : memref<16x128xf32, #tpu.memory_space<vmem>>, vector<16x128xf32>
    %c0_1 = arith.constant 0 : index
    %c0_2 = arith.constant 0 : index
    %1 = vector.load %arg2[%c0_1, %c0_2] : memref<1152x128xf32, #tpu.memory_space<vmem>>, vector<128x128xf32>
    %c0_3 = arith.constant 0 : index
    %c0_4 = arith.constant 0 : index
    %2 = vector.load %arg3[%c0_3, %c0_4] : memref<16x128xf32, #tpu.memory_space<vmem>>, vector<1x128xf32>
    %cst = arith.constant dense<0.000000e+00> : vector<16x128xf32>
    %3 = tpu.matmul %0, %1, %cst {dimension_numbers = #tpu.dot_dimension_numbers<[1], [0], [0], [1], [0, 0, 1, 1], [], []>} : vector<16x128xf32>, vector<128x128xf32>, vector<16x128xf32> -> vector<16x128xf32>
    %4 = vector.broadcast %2 : vector<1x128xf32> to vector<16x128xf32>
    %5 = arith.addf %3, %4 : vector<16x128xf32>
    %cst_5 = arith.constant 0.000000e+00 : f32
    %6 = vector.broadcast %cst_5 : f32 to vector<16x128xf32>
    %7 = arith.maximumf %5, %6 : vector<16x128xf32>
    %c128 = arith.constant 128 : index
    %c0_6 = arith.constant 0 : index
    %8 = vector.load %arg2[%c128, %c0_6] : memref<1152x128xf32, #tpu.memory_space<vmem>>, vector<128x128xf32>
    %c1 = arith.constant 1 : index
    %c0_7 = arith.constant 0 : index
    %9 = vector.load %arg3[%c1, %c0_7] : memref<16x128xf32, #tpu.memory_space<vmem>>, vector<1x128xf32>
    %cst_8 = arith.constant dense<0.000000e+00> : vector<16x128xf32>
    %10 = tpu.matmul %7, %8, %cst_8 {dimension_numbers = #tpu.dot_dimension_numbers<[1], [0], [0], [1], [0, 0, 1, 1], [], []>} : vector<16x128xf32>, vector<128x128xf32>, vector<16x128xf32> -> vector<16x128xf32>
    %11 = vector.broadcast %9 : vector<1x128xf32> to vector<16x128xf32>
    %12 = arith.addf %10, %11 : vector<16x128xf32>
    %cst_9 = arith.constant 0.000000e+00 : f32
    %13 = vector.broadcast %cst_9 : f32 to vector<16x128xf32>
    %14 = arith.maximumf %12, %13 : vector<16x128xf32>
    %c256 = arith.constant 256 : index
    %c0_10 = arith.constant 0 : index
    %15 = vector.load %arg2[%c256, %c0_10] : memref<1152x128xf32, #tpu.memory_space<vmem>>, vector<128x128xf32>
    %c2 = arith.constant 2 : index
    %c0_11 = arith.constant 0 : index
    %16 = vector.load %arg3[%c2, %c0_11] : memref<16x128xf32, #tpu.memory_space<vmem>>, vector<1x128xf32>
    %cst_12 = arith.constant dense<0.000000e+00> : vector<16x128xf32>
    %17 = tpu.matmul %14, %15, %cst_12 {dimension_numbers = #tpu.dot_dimension_numbers<[1], [0], [0], [1], [0, 0, 1, 1], [], []>} : vector<16x128xf32>, vector<128x128xf32>, vector<16x128xf32> -> vector<16x128xf32>
    %18 = vector.broadcast %16 : vector<1x128xf32> to vector<16x128xf32>
    %19 = arith.addf %17, %18 : vector<16x128xf32>
    %cst_13 = arith.constant 0.000000e+00 : f32
    %20 = vector.broadcast %cst_13 : f32 to vector<16x128xf32>
    %21 = arith.maximumf %19, %20 : vector<16x128xf32>
    %22 = arith.addf %19, %21 : vector<16x128xf32>
    %c384 = arith.constant 384 : index
    %c0_14 = arith.constant 0 : index
    %23 = vector.load %arg2[%c384, %c0_14] : memref<1152x128xf32, #tpu.memory_space<vmem>>, vector<128x128xf32>
    %c3 = arith.constant 3 : index
    %c0_15 = arith.constant 0 : index
    %24 = vector.load %arg3[%c3, %c0_15] : memref<16x128xf32, #tpu.memory_space<vmem>>, vector<1x128xf32>
    %cst_16 = arith.constant dense<0.000000e+00> : vector<16x128xf32>
    %25 = tpu.matmul %22, %23, %cst_16 {dimension_numbers = #tpu.dot_dimension_numbers<[1], [0], [0], [1], [0, 0, 1, 1], [], []>} : vector<16x128xf32>, vector<128x128xf32>, vector<16x128xf32> -> vector<16x128xf32>
    %26 = vector.broadcast %24 : vector<1x128xf32> to vector<16x128xf32>
    %27 = arith.addf %25, %26 : vector<16x128xf32>
    %cst_17 = arith.constant 0.000000e+00 : f32
    %28 = vector.broadcast %cst_17 : f32 to vector<16x128xf32>
    %29 = arith.maximumf %27, %28 : vector<16x128xf32>
    %c512 = arith.constant 512 : index
    %c0_18 = arith.constant 0 : index
    %30 = vector.load %arg2[%c512, %c0_18] : memref<1152x128xf32, #tpu.memory_space<vmem>>, vector<128x128xf32>
    %c4 = arith.constant 4 : index
    %c0_19 = arith.constant 0 : index
    %31 = vector.load %arg3[%c4, %c0_19] : memref<16x128xf32, #tpu.memory_space<vmem>>, vector<1x128xf32>
    %cst_20 = arith.constant dense<0.000000e+00> : vector<16x128xf32>
    %32 = tpu.matmul %29, %30, %cst_20 {dimension_numbers = #tpu.dot_dimension_numbers<[1], [0], [0], [1], [0, 0, 1, 1], [], []>} : vector<16x128xf32>, vector<128x128xf32>, vector<16x128xf32> -> vector<16x128xf32>
    %33 = vector.broadcast %31 : vector<1x128xf32> to vector<16x128xf32>
    %34 = arith.addf %32, %33 : vector<16x128xf32>
    %cst_21 = arith.constant 0.000000e+00 : f32
    %35 = vector.broadcast %cst_21 : f32 to vector<16x128xf32>
    %36 = arith.maximumf %34, %35 : vector<16x128xf32>
    %c640 = arith.constant 640 : index
    %c0_22 = arith.constant 0 : index
    %37 = vector.load %arg2[%c640, %c0_22] : memref<1152x128xf32, #tpu.memory_space<vmem>>, vector<128x128xf32>
    %c5 = arith.constant 5 : index
    %c0_23 = arith.constant 0 : index
    %38 = vector.load %arg3[%c5, %c0_23] : memref<16x128xf32, #tpu.memory_space<vmem>>, vector<1x128xf32>
    %cst_24 = arith.constant dense<0.000000e+00> : vector<16x128xf32>
    %39 = tpu.matmul %36, %37, %cst_24 {dimension_numbers = #tpu.dot_dimension_numbers<[1], [0], [0], [1], [0, 0, 1, 1], [], []>} : vector<16x128xf32>, vector<128x128xf32>, vector<16x128xf32> -> vector<16x128xf32>
    %40 = vector.broadcast %38 : vector<1x128xf32> to vector<16x128xf32>
    %41 = arith.addf %39, %40 : vector<16x128xf32>
    %cst_25 = arith.constant 0.000000e+00 : f32
    %42 = vector.broadcast %cst_25 : f32 to vector<16x128xf32>
    %43 = arith.maximumf %41, %42 : vector<16x128xf32>
    %c768 = arith.constant 768 : index
    %c0_26 = arith.constant 0 : index
    %44 = vector.load %arg2[%c768, %c0_26] : memref<1152x128xf32, #tpu.memory_space<vmem>>, vector<128x128xf32>
    %c6 = arith.constant 6 : index
    %c0_27 = arith.constant 0 : index
    %45 = vector.load %arg3[%c6, %c0_27] : memref<16x128xf32, #tpu.memory_space<vmem>>, vector<1x128xf32>
    %cst_28 = arith.constant dense<0.000000e+00> : vector<16x128xf32>
    %46 = tpu.matmul %43, %44, %cst_28 {dimension_numbers = #tpu.dot_dimension_numbers<[1], [0], [0], [1], [0, 0, 1, 1], [], []>} : vector<16x128xf32>, vector<128x128xf32>, vector<16x128xf32> -> vector<16x128xf32>
    %47 = vector.broadcast %45 : vector<1x128xf32> to vector<16x128xf32>
    %48 = arith.addf %46, %47 : vector<16x128xf32>
    %cst_29 = arith.constant 0.000000e+00 : f32
    %49 = vector.broadcast %cst_29 : f32 to vector<16x128xf32>
    %50 = arith.maximumf %48, %49 : vector<16x128xf32>
    %c896 = arith.constant 896 : index
    %c0_30 = arith.constant 0 : index
    %51 = vector.load %arg2[%c896, %c0_30] : memref<1152x128xf32, #tpu.memory_space<vmem>>, vector<128x128xf32>
    %c7 = arith.constant 7 : index
    %c0_31 = arith.constant 0 : index
    %52 = vector.load %arg3[%c7, %c0_31] : memref<16x128xf32, #tpu.memory_space<vmem>>, vector<1x128xf32>
    %cst_32 = arith.constant dense<0.000000e+00> : vector<16x128xf32>
    %53 = tpu.matmul %50, %51, %cst_32 {dimension_numbers = #tpu.dot_dimension_numbers<[1], [0], [0], [1], [0, 0, 1, 1], [], []>} : vector<16x128xf32>, vector<128x128xf32>, vector<16x128xf32> -> vector<16x128xf32>
    %54 = vector.broadcast %52 : vector<1x128xf32> to vector<16x128xf32>
    %55 = arith.addf %53, %54 : vector<16x128xf32>
    %cst_33 = arith.constant 0.000000e+00 : f32
    %56 = vector.broadcast %cst_33 : f32 to vector<16x128xf32>
    %57 = arith.maximumf %55, %56 : vector<16x128xf32>
    %c1024 = arith.constant 1024 : index
    %c0_34 = arith.constant 0 : index
    %58 = vector.load %arg2[%c1024, %c0_34] : memref<1152x128xf32, #tpu.memory_space<vmem>>, vector<128x128xf32>
    %c8 = arith.constant 8 : index
    %c0_35 = arith.constant 0 : index
    %59 = vector.load %arg3[%c8, %c0_35] : memref<16x128xf32, #tpu.memory_space<vmem>>, vector<1x128xf32>
    %cst_36 = arith.constant dense<0.000000e+00> : vector<16x128xf32>
    %60 = tpu.matmul %57, %58, %cst_36 {dimension_numbers = #tpu.dot_dimension_numbers<[1], [0], [0], [1], [0, 0, 1, 1], [], []>} : vector<16x128xf32>, vector<128x128xf32>, vector<16x128xf32> -> vector<16x128xf32>
    %61 = vector.broadcast %59 : vector<1x128xf32> to vector<16x128xf32>
    %62 = arith.addf %60, %61 : vector<16x128xf32>
    %c0_37 = arith.constant 0 : index
    %c0_38 = arith.constant 0 : index
    %63 = vector.load %arg4[%c0_37, %c0_38] : memref<16x128xf32, #tpu.memory_space<vmem>>, vector<16x128xf32>
    tpu.vector_store %arg4[%c0_37, %c0_38], %62 {strides = array<i32>} : memref<16x128xf32, #tpu.memory_space<vmem>>, vector<16x128xf32>,
    return
  }
  func.func @transform_0(%arg0: i32) -> (i32, i32) {
    %c0_i32 = arith.constant 0 : i32
    %c0_i32_0 = arith.constant 0 : i32
    return %arg0, %c0_i32 : i32, i32
  }
  func.func @transform_1(%arg0: i32) -> (i32, i32) {
    %c0_i32 = arith.constant 0 : i32
    %c0_i32_0 = arith.constant 0 : i32
    %c0_i32_1 = arith.constant 0 : i32
    return %c0_i32, %c0_i32_0 : i32, i32
  }
  func.func @transform_2(%arg0: i32) -> (i32, i32) {
    %c0_i32 = arith.constant 0 : i32
    %c0_i32_0 = arith.constant 0 : i32
    %c0_i32_1 = arith.constant 0 : i32
    return %c0_i32, %c0_i32_0 : i32, i32
  }
  func.func @transform_3(%arg0: i32) -> (i32, i32) {
    %c0_i32 = arith.constant 0 : i32
    %c0_i32_0 = arith.constant 0 : i32
    return %arg0, %c0_i32 : i32, i32
  }
}

</mosaic_0001>

<bundles_post_ra>
// kernel: snet_forward.1
= control target key start
LH: loop header
LB: loop body
LE: loop exit
PB: predicated region body
PF: predicated region fallthrough
CT: control target
= control target key end

     0   :  { %s2169_s1 = inlined_call_operand.vmem [shape: f32[1152,128], index: 1, kind: input, shape index: {}]   ;;  %s2170_s0 = inlined_call_operand.vmem [shape: f32[16,128], index: 0, kind: input, shape index: {}]   ;;  %s2171_s2 = inlined_call_operand.vmem [shape: f32[16,128], index: 2, kind: input, shape index: {}]   ;;  %s2172_s3 = inlined_call_operand.vmem [shape: f32[16,128], index: 3, kind: output, shape index: {}]  }
   0x1   :  { %v16_v0 = vld [vmem:[%s2169_s1] sm:$0xff]  ;;  %v17_v1 = vld [vmem:[%s2169_s1 + $0x8] sm:$0xff]  ;;  %v18_v2 = vld [vmem:[%s2169_s1 + $0x10] sm:$0xff] }
   0x2   :  { %v1390_v3 = vpack.c.bf16 %v17_v1, %v16_v0  ;;  %v19_v4 = vld [vmem:[%s2169_s1 + $0x18] sm:$0xff]  ;;  %v20_v6 = vld [vmem:[%s2169_s1 + $0x20] sm:$0xff]  ;;  %v21_v7 = vld [vmem:[%s2169_s1 + $0x28] sm:$0xff] }
   0x3   :  { %v1394_v5 = vpack.c.bf16 %v19_v4, %v18_v2  ;;  %v1398_v8 = vpack.c.bf16 %v21_v7, %v20_v6  ;;  %v22_v9 = vld [vmem:[%s2169_s1 + $0x30] sm:$0xff]  ;;  %v23_v10 = vld [vmem:[%s2169_s1 + $0x38] sm:$0xff]  ;;  %v14_v11 = vld [vmem:[%s2170_s0] sm:$0xff] }
   0x4   :  { %1391 = vmatprep.subr.bf16.mxu0 %v1390_v3  ;;  %1107 = vmatprep.mubr.f32.mxu0 %v14_v11  ;;  %v114_v12 = vld [vmem:[%s2169_s1 + $0x80] sm:$0xff]  ;;  %v115_v13 = vld [vmem:[%s2169_s1 + $0x88] sm:$0xff]  ;;  %v116_v14 = vld [vmem:[%s2169_s1 + $0x90] sm:$0xff]  ;;  %v1402_v20 = vpack.c.bf16 %v23_v10, %v22_v9 }
   0x5   :  { %1393 = vmatpush3.bf16.msra.mxu0 %v1390_v3  ;;  %v1422_v15 = vpack.c.bf16 %v115_v13, %v114_v12  ;;  %v117_v16 = vld [vmem:[%s2169_s1 + $0x98] sm:$0xff]  ;;  %v118_v18 = vld [vmem:[%s2169_s1 + $0xa0] sm:$0xff]  ;;  %v119_v19 = vld [vmem:[%s2169_s1 + $0xa8] sm:$0xff] }
   0x6   :  { %1395 = vmatprep.subr.bf16.mxu0 %v1394_v5  ;;  %v1426_v17 = vpack.c.bf16 %v117_v16, %v116_v14  ;;  %v24_v21 = vld [vmem:[%s2169_s1 + $0x40] sm:$0xff]  ;;  %v25_v22 = vld [vmem:[%s2169_s1 + $0x48] sm:$0xff]  ;;  %v1430_v23 = vpack.c.bf16 %v119_v19, %v118_v18  ;;  %v120_v24 = vld [vmem:[%s2169_s1 + $0xb0] sm:$0xff] }
   0x7   :  { %1423 = vmatprep.subr.bf16.mxu1 %v1422_v15  ;;  %v121_v25 = vld [vmem:[%s2169_s1 + $0xb8] sm:$0xff]  ;;  %v1406_v26 = vpack.c.bf16 %v25_v22, %v24_v21  ;;  %v26_v27 = vld [vmem:[%s2169_s1 + $0x50] sm:$0xff]  ;;  %v122_v30 = vld [vmem:[%s2169_s1 + $0xc0] sm:$0xff] }
   0x8   :  { %1425 = vmatpush3.bf16.msra.mxu1 %v1422_v15  ;;  %v27_v28 = vld [vmem:[%s2169_s1 + $0x58] sm:$0xff]  ;;  %v1434_v29 = vpack.c.bf16 %v121_v25, %v120_v24  ;;  %v123_v31 = vld [vmem:[%s2169_s1 + $0xc8] sm:$0xff]  ;;  %v28_v33 = vld [vmem:[%s2169_s1 + $0x60] sm:$0xff] }
   0x9   :  { %1397 = vmatpush3.bf16.msra.mxu0 %v1394_v5  ;;  %1427 = vmatprep.subr.bf16.mxu1 %v1426_v17  ;;  %v1410_v32 = vpack.c.bf16 %v27_v28, %v26_v27  ;;  %v29_v34 = vld [vmem:[%s2169_s1 + $0x68] sm:$0xff]  ;;  %v1438_v35 = vpack.c.bf16 %v123_v31, %v122_v30  ;;  %v124_v36 = vld [vmem:[%s2169_s1 + $0xd0] sm:$0xff]  ;;  %v125_v37 = vld [vmem:[%s2169_s1 + $0xd8] sm:$0xff] }
   0xa   :  { %1399 = vmatprep.subr.bf16.mxu0 %v1398_v8  ;;  %v1414_v38 = vpack.c.bf16 %v29_v34, %v28_v33  ;;  %v30_v39 = vld [vmem:[%s2169_s1 + $0x70] sm:$0xff]  ;;  %v31_v40 = vld [vmem:[%s2169_s1 + $0x78] sm:$0xff]  ;;  %v1442_v41 = vpack.c.bf16 %v125_v37, %v124_v36  ;;  %v126_v42 = vld [vmem:[%s2169_s1 + $0xe0] sm:$0xff] }
   0xb   :  { %v127_v43 = vld [vmem:[%s2169_s1 + $0xe8] sm:$0xff]  ;;  %v1418_v44 = vpack.c.bf16 %v31_v40, %v30_v39  ;;  %v128_v47 = vld [vmem:[%s2169_s1 + $0xf0] sm:$0xff]  ;;  %v129_v48 = vld [vmem:[%s2169_s1 + $0xf8] sm:$0xff] }
   0xc   :  { %1429 = vmatpush3.bf16.msra.mxu1 %v1426_v17  ;;  %v1446_v45 = vpack.c.bf16 %v127_v43, %v126_v42  ;;  %v15_v46 = vld [vmem:[%s2170_s0 + $0x8] sm:$0xff]  ;;  %v1450_v49 = vpack.c.bf16 %v129_v48, %v128_v47  ;;  %v212_v50 = vld [vmem:[%s2169_s1 + $0x100] sm:$0xff]  ;;  %v214_v52 = vld [vmem:[%s2169_s1 + $0x110] sm:$0xff] }
   0xd   :  { %1401 = vmatpush3.bf16.msra.mxu0 %v1398_v8  ;;  %1431 = vmatprep.subr.bf16.mxu1 %v1430_v23  ;;  %v213_v51 = vld [vmem:[%s2169_s1 + $0x108] sm:$0xff]  ;;  %v215_v54 = vld [vmem:[%s2169_s1 + $0x118] sm:$0xff]  ;;  %v216_v56 = vld [vmem:[%s2169_s1 + $0x120] sm:$0xff] }
   0xe   :  { %1403 = vmatprep.subr.bf16.mxu0 %v1402_v20  ;;  %v1454_v53 = vpack.c.bf16 %v213_v51, %v212_v50  ;;  %v1458_v55 = vpack.c.bf16 %v215_v54, %v214_v52  ;;  %v217_v57 = vld [vmem:[%s2169_s1 + $0x128] sm:$0xff]  ;;  %v218_v59 = vld [vmem:[%s2169_s1 + $0x130] sm:$0xff]  ;;  %v219_v60 = vld [vmem:[%s2169_s1 + $0x138] sm:$0xff] }
   0xf   :  { %v1462_v58 = vpack.c.bf16 %v217_v57, %v216_v56  ;;  %v1466_v61 = vpack.c.bf16 %v219_v60, %v218_v59  ;;  %v220_v62 = vld [vmem:[%s2169_s1 + $0x140] sm:$0xff]  ;;  %v221_v63 = vld [vmem:[%s2169_s1 + $0x148] sm:$0xff]  ;;  %v222_v1 = vld [vmem:[%s2169_s1 + $0x150] sm:$0xff] }
  0x10   :  { %1433 = vmatpush3.bf16.msra.mxu1 %v1430_v23  ;;  %v1470_v0 = vpack.c.bf16 %v221_v63, %v220_v62  ;;  %v223_v2 = vld [vmem:[%s2169_s1 + $0x158] sm:$0xff]  ;;  %v224_v4 = vld [vmem:[%s2169_s1 + $0x160] sm:$0xff]  ;;  %v225_v5 = vld [vmem:[%s2169_s1 + $0x168] sm:$0xff] }
  0x11   :  { %1405 = vmatpush3.bf16.msra.mxu0 %v1402_v20  ;;  %1435 = vmatprep.subr.bf16.mxu1 %v1434_v29  ;;  %v1474_v3 = vpack.c.bf16 %v223_v2, %v222_v1  ;;  %v1478_v6 = vpack.c.bf16 %v225_v5, %v224_v4  ;;  %v904_v7 = vld [vmem:[%s2171_s2] ss:$0 sm:$0xff]  ;;  %v226_v14 = vld [vmem:[%s2169_s1 + $0x170] sm:$0xff]  ;;  %v227_v15 = vld [vmem:[%s2169_s1 + $0x178] sm:$0xff] }
  0x12   :  { %1407 = vmatprep.subr.bf16.mxu0 %v1406_v26  ;;  %v1482_v16 = vpack.c.bf16 %v227_v15, %v226_v14  ;;  %v312_v17 = vld [vmem:[%s2169_s1 + $0x180] sm:$0xff]  ;;  %v313_v18 = vld [vmem:[%s2169_s1 + $0x188] sm:$0xff]  ;;  %v314_v19 = vld [vmem:[%s2169_s1 + $0x190] sm:$0xff] }
  0x13   :  { %v1486_v20 = vpack.c.bf16 %v313_v18, %v312_v17  ;;  %v315_v21 = vld [vmem:[%s2169_s1 + $0x198] sm:$0xff]  ;;  %v316_v23 = vld [vmem:[%s2169_s1 + $0x1a0] sm:$0xff]  ;;  %v317_v24 = vld [vmem:[%s2169_s1 + $0x1a8] sm:$0xff] }
  0x14   :  { %1437 = vmatpush3.bf16.msra.mxu1 %v1434_v29  ;;  %v1490_v22 = vpack.c.bf16 %v315_v21, %v314_v19  ;;  %v1494_v25 = vpack.c.bf16 %v317_v24, %v316_v23  ;;  %v319_v27 = vld [vmem:[%s2169_s1 + $0x1b8] sm:$0xff]  ;;  %v320_v29 = vld [vmem:[%s2169_s1 + $0x1c0] sm:$0xff]  ;;  %v321_v30 = vld [vmem:[%s2169_s1 + $0x1c8] sm:$0xff] }
  0x15   :  { %1409 = vmatpush3.bf16.msra.mxu0 %v1406_v26  ;;  %1439 = vmatprep.subr.bf16.mxu1 %v1438_v35  ;;  %v318_v26 = vld [vmem:[%s2169_s1 + $0x1b0] sm:$0xff]  ;;  %v1502_v31 = vpack.c.bf16 %v321_v30, %v320_v29  ;;  %v323_v33 = vld [vmem:[%s2169_s1 + $0x1d8] sm:$0xff]  ;;  %v324_v42 = vld [vmem:[%s2169_s1 + $0x1e0] sm:$0xff] }
  0x16   :  { %1411 = vmatprep.subr.bf16.mxu0 %v1410_v32  ;;  %v1498_v28 = vpack.c.bf16 %v319_v27, %v318_v26  ;;  %v325_v43 = vld [vmem:[%s2169_s1 + $0x1e8] sm:$0xff]  ;;  %v410_v48 = vld [vmem:[%s2169_s1 + $0x200] sm:$0xff]  ;;  %v412_v50 = vld [vmem:[%s2169_s1 + $0x210] sm:$0xff] }
  0x17   :  { %v413_v52 = vld [vmem:[%s2169_s1 + $0x218] sm:$0xff]  ;;  %v414_v54 = vld [vmem:[%s2169_s1 + $0x220] sm:$0xff]  ;;  %v416_v57 = vld [vmem:[%s2169_s1 + $0x230] sm:$0xff] }
  0x18   :  { %1441 = vmatpush3.bf16.msra.mxu1 %v1438_v35  ;;  %v905_v35 = vld [vmem:[%s2171_s2 + $0x1] ss:$0 sm:$0xff]  ;;  %v420_v63 = vld [vmem:[%s2169_s1 + $0x250] sm:$0xff]  ;;  %v906_v5 = vld [vmem:[%s2171_s2 + $0x2] ss:$0 sm:$0xff] }
  0x19   :  { %1413 = vmatpush3.bf16.msra.mxu0 %v1410_v32  ;;  %1443 = vmatprep.subr.bf16.mxu1 %v1442_v41  ;;  %v322_v32 = vld [vmem:[%s2169_s1 + $0x1d0] sm:$0xff]  ;;  %v418_v60 = vld [vmem:[%s2169_s1 + $0x240] sm:$0xff]  ;;  %v425_v15 = vld [vmem:[%s2169_s1 + $0x278] sm:$0xff] }
  0x1a   :  { %1415 = vmatprep.subr.bf16.mxu0 %v1414_v38  ;;  %v1506_v34 = vpack.c.bf16 %v323_v33, %v322_v32  ;;  %v422_v2 = vld [vmem:[%s2169_s1 + $0x260] sm:$0xff]  ;;  %v424_v14 = vld [vmem:[%s2169_s1 + $0x270] sm:$0xff]  ;;  %v509_v18 = vld [vmem:[%s2169_s1 + $0x288] sm:$0xff] }
  0x1b   :  { %v508_v17 = vld [vmem:[%s2169_s1 + $0x280] sm:$0xff]  ;;  %v510_v19 = vld [vmem:[%s2169_s1 + $0x290] sm:$0xff]  ;;  %v511_v21 = vld [vmem:[%s2169_s1 + $0x298] sm:$0xff] }
  0x1c   :  { %1445 = vmatpush3.bf16.msra.mxu1 %v1442_v41  ;;  %v512_v23 = vld [vmem:[%s2169_s1 + $0x2a0] sm:$0xff]  ;;  %v513_v24 = vld [vmem:[%s2169_s1 + $0x2a8] sm:$0xff]  ;;  %v514_v26 = vld [vmem:[%s2169_s1 + $0x2b0] sm:$0xff] }
  0x1d   :  { %1417 = vmatpush3.bf16.msra.mxu0 %v1414_v38  ;;  %1447 = vmatprep.subr.bf16.mxu1 %v1446_v45  ;;  %v515_v27 = vld [vmem:[%s2169_s1 + $0x2b8] sm:$0xff]  ;;  %v516_v29 = vld [vmem:[%s2169_s1 + $0x2c0] sm:$0xff]  ;;  %v517_v30 = vld [vmem:[%s2169_s1 + $0x2c8] sm:$0xff] }
  0x1e   :  { %1419 = vmatprep.subr.bf16.mxu0 %v1418_v44  ;;  %v518_v32 = vld [vmem:[%s2169_s1 + $0x2d0] sm:$0xff]  ;;  %v519_v33 = vld [vmem:[%s2169_s1 + $0x2d8] sm:$0xff] }
  0x20   :  { %1449 = vmatpush3.bf16.msra.mxu1 %v1446_v45  ;;  %v326_v45 = vld [vmem:[%s2169_s1 + $0x1f0] sm:$0xff] }
  0x21   :  { %1421 = vmatpush3.bf16.msra.mxu0 %v1418_v44  ;;  %1451 = vmatprep.subr.bf16.mxu1 %v1450_v49  ;;  %v1510_v44 = vpack.c.bf16 %v325_v43, %v324_v42 }
  0x22   :  { %1455 = vmatprep.subr.bf16.mxu0 %v1454_v53 }
  0x24   :  { %1108 = vmatmul.mubr.f32.vlgmr.msra.gmra.mrb[0].mxu0 %v15_v46  ;;  %1453 = vmatpush3.bf16.msra.mxu1 %v1450_v49  ;;  %v327_v46 = vld [vmem:[%s2169_s1 + $0x1f8] sm:$0xff]  ;;  %v411_v49 = vld [vmem:[%s2169_s1 + $0x208] sm:$0xff] }
  0x25   :  { %1457 = vmatpush3.bf16.msra.mxu0 %v1454_v53  ;;  %1487 = vmatprep.subr.bf16.mxu1 %v1486_v20  ;;  %v1514_v47 = vpack.c.bf16 %v327_v46, %v326_v45  ;;  %v1518_v51 = vpack.c.bf16 %v411_v49, %v410_v48  ;;  %v1522_v53 = vpack.c.bf16 %v413_v52, %v412_v50  ;;  %v522_v45 = vld [vmem:[%s2169_s1 + $0x2f0] sm:$0xff]  ;;  %v523_v46 = vld [vmem:[%s2169_s1 + $0x2f8] sm:$0xff]  ;;  %v606_v48 = vld [vmem:[%s2169_s1 + $0x300] sm:$0xff] }
  0x26   :  { %1459 = vmatprep.subr.bf16.mxu0 %v1458_v55  ;;  %v607_v49 = vld [vmem:[%s2169_s1 + $0x308] sm:$0xff]  ;;  %v608_v50 = vld [vmem:[%s2169_s1 + $0x310] sm:$0xff]  ;;  %v609_v52 = vld [vmem:[%s2169_s1 + $0x318] sm:$0xff] }
  0x29   :  { %1461 = vmatpush3.bf16.msra.mxu0 %v1458_v55  ;;  %v415_v55 = vld [vmem:[%s2169_s1 + $0x228] sm:$0xff] }
  0x2a   :  { %1463 = vmatprep.subr.bf16.mxu0 %v1462_v58  ;;  %v1526_v56 = vpack.c.bf16 %v415_v55, %v414_v54  ;;  %v610_v54 = vld [vmem:[%s2169_s1 + $0x320] sm:$0xff]  ;;  %v611_v55 = vld [vmem:[%s2169_s1 + $0x328] sm:$0xff] }
  0x2d   :  { %1465 = vmatpush3.bf16.msra.mxu0 %v1462_v58  ;;  %v417_v58 = vld [vmem:[%s2169_s1 + $0x238] sm:$0xff] }
  0x2e   :  { %1467 = vmatprep.subr.bf16.mxu0 %v1466_v61  ;;  %v1530_v59 = vpack.c.bf16 %v417_v58, %v416_v57  ;;  %v612_v57 = vld [vmem:[%s2169_s1 + $0x330] sm:$0xff]  ;;  %v613_v58 = vld [vmem:[%s2169_s1 + $0x338] sm:$0xff] }
  0x31   :  { %1469 = vmatpush3.bf16.msra.mxu0 %v1466_v61  ;;  %v419_v61 = vld [vmem:[%s2169_s1 + $0x248] sm:$0xff] }
  0x32   :  { %1471 = vmatprep.subr.bf16.mxu0 %v1470_v0  ;;  %v1534_v62 = vpack.c.bf16 %v419_v61, %v418_v60  ;;  %v614_v60 = vld [vmem:[%s2169_s1 + $0x340] sm:$0xff]  ;;  %v615_v61 = vld [vmem:[%s2169_s1 + $0x348] sm:$0xff] }
  0x35   :  { %1473 = vmatpush3.bf16.msra.mxu0 %v1470_v0  ;;  %v421_v0 = vld [vmem:[%s2169_s1 + $0x258] sm:$0xff] }
  0x36   :  { %1475 = vmatprep.subr.bf16.mxu0 %v1474_v3  ;;  %v1538_v1 = vpack.c.bf16 %v421_v0, %v420_v63  ;;  %v616_v63 = vld [vmem:[%s2169_s1 + $0x350] sm:$0xff]  ;;  %v617_v0 = vld [vmem:[%s2169_s1 + $0x358] sm:$0xff] }
  0x39   :  { %1477 = vmatpush3.bf16.msra.mxu0 %v1474_v3  ;;  %v423_v3 = vld [vmem:[%s2169_s1 + $0x268] sm:$0xff] }
  0x3a   :  { %1479 = vmatprep.subr.bf16.mxu0 %v1478_v6  ;;  %v1542_v4 = vpack.c.bf16 %v423_v3, %v422_v2  ;;  %v618_v2 = vld [vmem:[%s2169_s1 + $0x360] sm:$0xff]  ;;  %v619_v3 = vld [vmem:[%s2169_s1 + $0x368] sm:$0xff] }
  0x3d   :  { %1481 = vmatpush3.bf16.msra.mxu0 %v1478_v6 }
  0x3e   :  { %1483 = vmatprep.subr.bf16.mxu0 %v1482_v16 }
  0x41   :  { %1485 = vmatpush3.bf16.msra.mxu0 %v1482_v16  ;;  %v1546_v16 = vpack.c.bf16 %v425_v15, %v424_v14  ;;  %v704_v15 = vld [vmem:[%s2169_s1 + $0x380] sm:$0xff] }
  0x42   :  { %1519 = vmatprep.subr.bf16.mxu0 %v1518_v51 }
  0xf7   :  { %v1109_v8 = vpop.f32.mrb[0].mxu0 }
  0xf8   :  { %v109_v9 = vadd.f32 %v1109_v8, %v904_v7  ;;  %v103_v10 = vpop.f32.mrb[1].mxu0 }
  0xf9   :  { %v104_v11 = vadd.f32 %v904_v7, %v103_v10 }
  0xfa   :  { %v113_v13 = vmax.f32 %v109_v9, 0.0 }
  0xfb   :  { %v112_v12 = vmax.f32 %v104_v11, 0.0 }
  0xfd   :  { %1142 = vmatprep.mubr.f32.mxu1 %v112_v12 }
  0xfe   :  { %1143 = vmatmul.mubr.f32.vlgmr.msra.gmra.mrb[0].mxu1 %v113_v13 }
  0xff   :  { %1489 = vmatpush3.bf16.msra.mxu1 %v1486_v20  ;;  %v1550_v20 = vpack.c.bf16 %v509_v18, %v508_v17  ;;  %v706_v17 = vld [vmem:[%s2169_s1 + $0x390] sm:$0xff] }
 0x100   :  { %1491 = vmatprep.subr.bf16.mxu1 %v1490_v22 }
 0x103   :  { %1493 = vmatpush3.bf16.msra.mxu1 %v1490_v22  ;;  %v1554_v22 = vpack.c.bf16 %v511_v21, %v510_v19  ;;  %v707_v19 = vld [vmem:[%s2169_s1 + $0x398] sm:$0xff]  ;;  %v708_v21 = vld [vmem:[%s2169_s1 + $0x3a0] sm:$0xff] }
 0x104   :  { %1495 = vmatprep.subr.bf16.mxu1 %v1494_v25 }
 0x107   :  { %1497 = vmatpush3.bf16.msra.mxu1 %v1494_v25  ;;  %v1558_v25 = vpack.c.bf16 %v513_v24, %v512_v23  ;;  %v710_v24 = vld [vmem:[%s2169_s1 + $0x3b0] sm:$0xff] }
 0x108   :  { %1499 = vmatprep.subr.bf16.mxu1 %v1498_v28 }
 0x10b   :  { %1501 = vmatpush3.bf16.msra.mxu1 %v1498_v28  ;;  %v1562_v28 = vpack.c.bf16 %v515_v27, %v514_v26  ;;  %v712_v27 = vld [vmem:[%s2169_s1 + $0x3c0] sm:$0xff] }
 0x10c   :  { %1503 = vmatprep.subr.bf16.mxu1 %v1502_v31 }
 0x10f   :  { %1505 = vmatpush3.bf16.msra.mxu1 %v1502_v31  ;;  %v1566_v31 = vpack.c.bf16 %v517_v30, %v516_v29  ;;  %v714_v30 = vld [vmem:[%s2169_s1 + $0x3d0] sm:$0xff] }
 0x110   :  { %1507 = vmatprep.subr.bf16.mxu1 %v1506_v34 }
 0x113   :  { %1509 = vmatpush3.bf16.msra.mxu1 %v1506_v34  ;;  %v1570_v34 = vpack.c.bf16 %v519_v33, %v518_v32  ;;  %v716_v33 = vld [vmem:[%s2169_s1 + $0x3e0] sm:$0xff] }
 0x114   :  { %1511 = vmatprep.subr.bf16.mxu1 %v1510_v44 }
 0x117   :  { %1513 = vmatpush3.bf16.msra.mxu1 %v1510_v44 }
 0x118   :  { %1515 = vmatprep.subr.bf16.mxu1 %v1514_v47 }
 0x11b   :  { %1517 = vmatpush3.bf16.msra.mxu1 %v1514_v47  ;;  %v1578_v47 = vpack.c.bf16 %v523_v46, %v522_v45  ;;  %v802_v46 = vld [vmem:[%s2169_s1 + $0x400] sm:$0xff] }
 0x11c   :  { %1551 = vmatprep.subr.bf16.mxu1 %v1550_v20 }
 0x1d1   :  { %v1144_v36 = vpop.f32.mrb[0].mxu1 }
 0x1d2   :  { %v207_v37 = vadd.f32 %v1144_v36, %v905_v35  ;;  %v201_v38 = vpop.f32.mrb[1].mxu1  ;;  %v521_v36 = vld [vmem:[%s2169_s1 + $0x2e8] sm:$0xff] }
 0x1d3   :  { %v202_v39 = vadd.f32 %v905_v35, %v201_v38  ;;  %v520_v35 = vld [vmem:[%s2169_s1 + $0x2e0] sm:$0xff] }
 0x1d4   :  { %v211_v41 = vmax.f32 %v207_v37, 0.0  ;;  %v1574_v37 = vpack.c.bf16 %v521_v36, %v520_v35  ;;  %v907_v38 = vld [vmem:[%s2171_s2 + $0x3] ss:$0 sm:$0xff]  ;;  %v909_v36 = vld [vmem:[%s2171_s2 + $0x5] ss:$0 sm:$0xff] }
 0x1d5   :  { %v210_v40 = vmax.f32 %v202_v39, 0.0 }
 0x1d7   :  { %1177 = vmatprep.mubr.f32.mxu0 %v210_v40 }
 0x1d8   :  { %1178 = vmatmul.mubr.f32.vlgmr.msra.gmra.mrb[2].mxu0 %v211_v41 }
 0x1d9   :  { %1521 = vmatpush3.bf16.msra.mxu0 %v1518_v51  ;;  %v1582_v51 = vpack.c.bf16 %v607_v49, %v606_v48  ;;  %v804_v48 = vld [vmem:[%s2169_s1 + $0x410] sm:$0xff] }
 0x1da   :  { %1523 = vmatprep.subr.bf16.mxu0 %v1522_v53 }
 0x1dd   :  { %1525 = vmatpush3.bf16.msra.mxu0 %v1522_v53  ;;  %v1586_v53 = vpack.c.bf16 %v609_v52, %v608_v50  ;;  %v805_v50 = vld [vmem:[%s2169_s1 + $0x418] sm:$0xff]  ;;  %v806_v52 = vld [vmem:[%s2169_s1 + $0x420] sm:$0xff] }
 0x1de   :  { %1527 = vmatprep.subr.bf16.mxu0 %v1526_v56 }
 0x1e1   :  { %1529 = vmatpush3.bf16.msra.mxu0 %v1526_v56  ;;  %v1590_v56 = vpack.c.bf16 %v611_v55, %v610_v54  ;;  %v808_v55 = vld [vmem:[%s2169_s1 + $0x430] sm:$0xff] }
 0x1e2   :  { %1531 = vmatprep.subr.bf16.mxu0 %v1530_v59 }
 0x1e5   :  { %1533 = vmatpush3.bf16.msra.mxu0 %v1530_v59  ;;  %v1594_v59 = vpack.c.bf16 %v613_v58, %v612_v57  ;;  %v810_v58 = vld [vmem:[%s2169_s1 + $0x440] sm:$0xff] }
 0x1e6   :  { %1535 = vmatprep.subr.bf16.mxu0 %v1534_v62 }
 0x1e9   :  { %1537 = vmatpush3.bf16.msra.mxu0 %v1534_v62  ;;  %v1598_v62 = vpack.c.bf16 %v615_v61, %v614_v60  ;;  %v812_v61 = vld [vmem:[%s2169_s1 + $0x450] sm:$0xff] }
 0x1ea   :  { %1539 = vmatprep.subr.bf16.mxu0 %v1538_v1 }
 0x1ed   :  { %1541 = vmatpush3.bf16.msra.mxu0 %v1538_v1  ;;  %v1602_v1 = vpack.c.bf16 %v617_v0, %v616_v63  ;;  %v814_v0 = vld [vmem:[%s2169_s1 + $0x460] sm:$0xff] }
 0x1ee   :  { %1543 = vmatprep.subr.bf16.mxu0 %v1542_v4 }
 0x1f1   :  { %1545 = vmatpush3.bf16.msra.mxu0 %v1542_v4  ;;  %v1606_v4 = vpack.c.bf16 %v619_v3, %v618_v2  ;;  %v910_v3 = vld [vmem:[%s2171_s2 + $0x6] ss:$0 sm:$0xff] }
 0x1f2   :  { %1547 = vmatprep.subr.bf16.mxu0 %v1546_v16 }
 0x1f5   :  { %1549 = vmatpush3.bf16.msra.mxu0 %v1546_v16  ;;  %v705_v16 = vld [vmem:[%s2169_s1 + $0x388] sm:$0xff] }
 0x1f6   :  { %1583 = vmatprep.subr.bf16.mxu0 %v1582_v51  ;;  %v1614_v18 = vpack.c.bf16 %v705_v16, %v704_v15 }
 0x2ab   :  { %v1179_v6 = vpop.f32.mrb[2].mxu0 }
 0x2ac   :  { %v305_v7 = vadd.f32 %v1179_v6, %v906_v5  ;;  %v299_v8 = vpop.f32.mrb[3].mxu0 }
 0x2ad   :  { %v300_v9 = vadd.f32 %v906_v5, %v299_v8  ;;  %v908_v5 = vld [vmem:[%s2171_s2 + $0x4] ss:$0 sm:$0xff] }
 0x2ae   :  { %v309_v10 = vmax.f32 %v305_v7, 0.0 }
 0x2af   :  { %v308_v11 = vmax.f32 %v300_v9, 0.0 }
 0x2b0   :  { %v311_v13 = vadd.f32 %v309_v10, %v305_v7 }
 0x2b1   :  { %v310_v12 = vadd.f32 %v308_v11, %v300_v9 }
 0x2b3   :  { %1212 = vmatprep.mubr.f32.mxu1 %v310_v12  ;;  %v620_v12 = vld [vmem:[%s2169_s1 + $0x370] sm:$0xff] }
 0x2b4   :  { %1213 = vmatmul.mubr.f32.vlgmr.msra.gmra.mrb[2].mxu1 %v311_v13  ;;  %v621_v13 = vld [vmem:[%s2169_s1 + $0x378] sm:$0xff] }
 0x2b5   :  { %1553 = vmatpush3.bf16.msra.mxu1 %v1550_v20  ;;  %v1610_v14 = vpack.c.bf16 %v621_v13, %v620_v12  ;;  %v1618_v20 = vpack.c.bf16 %v707_v19, %v706_v17  ;;  %v911_v13 = vld [vmem:[%s2171_s2 + $0x7] ss:$0 sm:$0xff] }
 0x2b6   :  { %1555 = vmatprep.subr.bf16.mxu1 %v1554_v22 }
 0x2b9   :  { %1557 = vmatpush3.bf16.msra.mxu1 %v1554_v22  ;;  %v709_v22 = vld [vmem:[%s2169_s1 + $0x3a8] sm:$0xff] }
 0x2ba   :  { %1559 = vmatprep.subr.bf16.mxu1 %v1558_v25  ;;  %v1622_v23 = vpack.c.bf16 %v709_v22, %v708_v21 }
 0x2bd   :  { %1561 = vmatpush3.bf16.msra.mxu1 %v1558_v25  ;;  %v711_v25 = vld [vmem:[%s2169_s1 + $0x3b8] sm:$0xff] }
 0x2be   :  { %1563 = vmatprep.subr.bf16.mxu1 %v1562_v28  ;;  %v1626_v26 = vpack.c.bf16 %v711_v25, %v710_v24 }
 0x2c1   :  { %1565 = vmatpush3.bf16.msra.mxu1 %v1562_v28  ;;  %v713_v28 = vld [vmem:[%s2169_s1 + $0x3c8] sm:$0xff] }
 0x2c2   :  { %1567 = vmatprep.subr.bf16.mxu1 %v1566_v31  ;;  %v1630_v29 = vpack.c.bf16 %v713_v28, %v712_v27 }
 0x2c5   :  { %1569 = vmatpush3.bf16.msra.mxu1 %v1566_v31  ;;  %v715_v31 = vld [vmem:[%s2169_s1 + $0x3d8] sm:$0xff] }
 0x2c6   :  { %1571 = vmatprep.subr.bf16.mxu1 %v1570_v34  ;;  %v1634_v32 = vpack.c.bf16 %v715_v31, %v714_v30 }
 0x2c9   :  { %1573 = vmatpush3.bf16.msra.mxu1 %v1570_v34  ;;  %v717_v34 = vld [vmem:[%s2169_s1 + $0x3e8] sm:$0xff] }
 0x2ca   :  { %1575 = vmatprep.subr.bf16.mxu1 %v1574_v37  ;;  %v1638_v35 = vpack.c.bf16 %v717_v34, %v716_v33 }
 0x2cd   :  { %1577 = vmatpush3.bf16.msra.mxu1 %v1574_v37 }
 0x2ce   :  { %1579 = vmatprep.subr.bf16.mxu1 %v1578_v47 }
 0x2d1   :  { %1581 = vmatpush3.bf16.msra.mxu1 %v1578_v47  ;;  %v803_v47 = vld [vmem:[%s2169_s1 + $0x408] sm:$0xff] }
 0x2d2   :  { %1615 = vmatprep.subr.bf16.mxu1 %v1614_v18  ;;  %v1646_v49 = vpack.c.bf16 %v803_v47, %v802_v46 }
 0x387   :  { %v1214_v39 = vpop.f32.mrb[2].mxu1 }
 0x388   :  { %v405_v40 = vadd.f32 %v1214_v39, %v907_v38  ;;  %v399_v41 = vpop.f32.mrb[3].mxu1 }
 0x389   :  { %v400_v42 = vadd.f32 %v907_v38, %v399_v41 }
 0x38a   :  { %v409_v44 = vmax.f32 %v405_v40, 0.0 }
 0x38b   :  { %v408_v43 = vmax.f32 %v400_v42, 0.0 }
 0x38d   :  { %1247 = vmatprep.mubr.f32.mxu0 %v408_v43  ;;  %v718_v43 = vld [vmem:[%s2169_s1 + $0x3f0] sm:$0xff] }
 0x38e   :  { %1248 = vmatmul.mubr.f32.vlgmr.msra.gmra.mrb[4].mxu0 %v409_v44  ;;  %v719_v44 = vld [vmem:[%s2169_s1 + $0x3f8] sm:$0xff] }
 0x38f   :  { %1585 = vmatpush3.bf16.msra.mxu0 %v1582_v51  ;;  %v1642_v45 = vpack.c.bf16 %v719_v44, %v718_v43  ;;  %v1650_v51 = vpack.c.bf16 %v805_v50, %v804_v48 }
 0x390   :  { %1587 = vmatprep.subr.bf16.mxu0 %v1586_v53 }
 0x393   :  { %1589 = vmatpush3.bf16.msra.mxu0 %v1586_v53  ;;  %v807_v53 = vld [vmem:[%s2169_s1 + $0x428] sm:$0xff] }
 0x394   :  { %1591 = vmatprep.subr.bf16.mxu0 %v1590_v56  ;;  %v1654_v54 = vpack.c.bf16 %v807_v53, %v806_v52 }
 0x397   :  { %1593 = vmatpush3.bf16.msra.mxu0 %v1590_v56  ;;  %v809_v56 = vld [vmem:[%s2169_s1 + $0x438] sm:$0xff] }
 0x398   :  { %1595 = vmatprep.subr.bf16.mxu0 %v1594_v59  ;;  %v1658_v57 = vpack.c.bf16 %v809_v56, %v808_v55 }
 0x39b   :  { %1597 = vmatpush3.bf16.msra.mxu0 %v1594_v59  ;;  %v811_v59 = vld [vmem:[%s2169_s1 + $0x448] sm:$0xff] }
 0x39c   :  { %1599 = vmatprep.subr.bf16.mxu0 %v1598_v62  ;;  %v1662_v60 = vpack.c.bf16 %v811_v59, %v810_v58 }
 0x39f   :  { %1601 = vmatpush3.bf16.msra.mxu0 %v1598_v62  ;;  %v813_v62 = vld [vmem:[%s2169_s1 + $0x458] sm:$0xff] }
 0x3a0   :  { %1603 = vmatprep.subr.bf16.mxu0 %v1602_v1  ;;  %v1666_v63 = vpack.c.bf16 %v813_v62, %v812_v61 }
 0x3a3   :  { %1605 = vmatpush3.bf16.msra.mxu0 %v1602_v1  ;;  %v815_v1 = vld [vmem:[%s2169_s1 + $0x468] sm:$0xff] }
 0x3a4   :  { %1607 = vmatprep.subr.bf16.mxu0 %v1606_v4  ;;  %v1670_v2 = vpack.c.bf16 %v815_v1, %v814_v0 }
 0x3a7   :  { %1609 = vmatpush3.bf16.msra.mxu0 %v1606_v4 }
 0x3a8   :  { %1611 = vmatprep.subr.bf16.mxu0 %v1610_v14 }
 0x3ab   :  { %1613 = vmatpush3.bf16.msra.mxu0 %v1610_v14 }
 0x3ac   :  { %1647 = vmatprep.subr.bf16.mxu0 %v1646_v49 }
 0x461   :  { %v1249_v6 = vpop.f32.mrb[4].mxu0 }
 0x462   :  { %v503_v7 = vadd.f32 %v1249_v6, %v908_v5  ;;  %v497_v8 = vpop.f32.mrb[5].mxu0 }
 0x463   :  { %v498_v9 = vadd.f32 %v908_v5, %v497_v8 }
 0x464   :  { %v507_v11 = vmax.f32 %v503_v7, 0.0 }
 0x465   :  { %v506_v10 = vmax.f32 %v498_v9, 0.0 }
 0x467   :  { %1282 = vmatprep.mubr.f32.mxu1 %v506_v10  ;;  %v816_v10 = vld [vmem:[%s2169_s1 + $0x470] sm:$0xff] }
 0x468   :  { %1283 = vmatmul.mubr.f32.vlgmr.msra.gmra.mrb[4].mxu1 %v507_v11  ;;  %v817_v11 = vld [vmem:[%s2169_s1 + $0x478] sm:$0xff] }
 0x469   :  { %1617 = vmatpush3.bf16.msra.mxu1 %v1614_v18  ;;  %v1674_v12 = vpack.c.bf16 %v817_v11, %v816_v10 }
 0x46a   :  { %1619 = vmatprep.subr.bf16.mxu1 %v1618_v20 }
 0x46d   :  { %1621 = vmatpush3.bf16.msra.mxu1 %v1618_v20  ;;  %v912_v20 = vld [vmem:[%s2171_s2 + $0x8] ss:$0 sm:$0xff] }
 0x46e   :  { %1623 = vmatprep.subr.bf16.mxu1 %v1622_v23 }
 0x471   :  { %1625 = vmatpush3.bf16.msra.mxu1 %v1622_v23 }
 0x472   :  { %1627 = vmatprep.subr.bf16.mxu1 %v1626_v26 }
 0x475   :  { %1629 = vmatpush3.bf16.msra.mxu1 %v1626_v26 }
 0x476   :  { %1631 = vmatprep.subr.bf16.mxu1 %v1630_v29 }
 0x479   :  { %1633 = vmatpush3.bf16.msra.mxu1 %v1630_v29 }
 0x47a   :  { %1635 = vmatprep.subr.bf16.mxu1 %v1634_v32 }
 0x47d   :  { %1637 = vmatpush3.bf16.msra.mxu1 %v1634_v32 }
 0x47e   :  { %1639 = vmatprep.subr.bf16.mxu1 %v1638_v35 }
 0x481   :  { %1641 = vmatpush3.bf16.msra.mxu1 %v1638_v35 }
 0x482   :  { %1643 = vmatprep.subr.bf16.mxu1 %v1642_v45 }
 0x485   :  { %1645 = vmatpush3.bf16.msra.mxu1 %v1642_v45 }
 0x53b   :  { %v1284_v37 = vpop.f32.mrb[4].mxu1 }
 0x53c   :  { %v601_v38 = vadd.f32 %v1284_v37, %v909_v36  ;;  %v595_v39 = vpop.f32.mrb[5].mxu1 }
 0x53d   :  { %v596_v40 = vadd.f32 %v909_v36, %v595_v39 }
 0x53e   :  { %v605_v42 = vmax.f32 %v601_v38, 0.0 }
 0x53f   :  { %v604_v41 = vmax.f32 %v596_v40, 0.0 }
 0x541   :  { %1317 = vmatprep.mubr.f32.mxu0 %v604_v41 }
 0x542   :  { %1318 = vmatmul.mubr.f32.vlgmr.msra.gmra.mrb[6].mxu0 %v605_v42 }
 0x543   :  { %1649 = vmatpush3.bf16.msra.mxu0 %v1646_v49 }
 0x544   :  { %1651 = vmatprep.subr.bf16.mxu0 %v1650_v51 }
 0x547   :  { %1653 = vmatpush3.bf16.msra.mxu0 %v1650_v51 }
 0x548   :  { %1655 = vmatprep.subr.bf16.mxu0 %v1654_v54 }
 0x54b   :  { %1657 = vmatpush3.bf16.msra.mxu0 %v1654_v54 }
 0x54c   :  { %1659 = vmatprep.subr.bf16.mxu0 %v1658_v57 }
 0x54f   :  { %1661 = vmatpush3.bf16.msra.mxu0 %v1658_v57 }
 0x550   :  { %1663 = vmatprep.subr.bf16.mxu0 %v1662_v60 }
 0x553   :  { %1665 = vmatpush3.bf16.msra.mxu0 %v1662_v60 }
 0x554   :  { %1667 = vmatprep.subr.bf16.mxu0 %v1666_v63 }
 0x557   :  { %1669 = vmatpush3.bf16.msra.mxu0 %v1666_v63 }
 0x558   :  { %1671 = vmatprep.subr.bf16.mxu0 %v1670_v2 }
 0x55b   :  { %1673 = vmatpush3.bf16.msra.mxu0 %v1670_v2 }
 0x55c   :  { %1675 = vmatprep.subr.bf16.mxu0 %v1674_v12 }
 0x55f   :  { %1677 = vmatpush3.bf16.msra.mxu0 %v1674_v12 }
 0x615   :  { %v1319_v4 = vpop.f32.mrb[6].mxu0 }
 0x616   :  { %v699_v5 = vadd.f32 %v1319_v4, %v910_v3  ;;  %v693_v6 = vpop.f32.mrb[7].mxu0 }
 0x617   :  { %v694_v7 = vadd.f32 %v910_v3, %v693_v6 }
 0x618   :  { %v703_v9 = vmax.f32 %v699_v5, 0.0 }
 0x619   :  { %v702_v8 = vmax.f32 %v694_v7, 0.0 }
 0x61b   :  { %1352 = vmatprep.mubr.f32.mxu1 %v702_v8 }
 0x61c   :  { %1353 = vmatmul.mubr.f32.vlgmr.msra.gmra.mrb[6].mxu1 %v703_v9 }
 0x6ef   :  { %v1354_v14 = vpop.f32.mrb[6].mxu1 }
 0x6f0   :  { %v797_v15 = vadd.f32 %v1354_v14, %v911_v13  ;;  %v791_v16 = vpop.f32.mrb[7].mxu1 }
 0x6f1   :  { %v792_v17 = vadd.f32 %v911_v13, %v791_v16 }
 0x6f2   :  { %v801_v19 = vmax.f32 %v797_v15, 0.0 }
 0x6f3   :  { %v800_v18 = vmax.f32 %v792_v17, 0.0 }
 0x6f5   :  { %1387 = vmatprep.mubr.f32.mxu0 %v800_v18 }
 0x6f6   :  { %1388 = vmatmul.mubr.f32.vlgmr.msra.gmra.mrb[8].mxu0 %v801_v19 }
 0x7c9   :  { %v1389_v21 = vpop.f32.mrb[8].mxu0 }
 0x7ca   :  { %v895_v22 = vadd.f32 %v1389_v21, %v912_v20  ;;  %v889_v23 = vpop.f32.mrb[9].mxu0 }
 0x7cb   :  { %v890_v24 = vadd.f32 %v912_v20, %v889_v23 }
 0x7cc   :  { %899 = vst [vmem:[%s2172_s3 + $0x8] sm:$0xff] %v895_v22 }
 0x7cd   :  { %898 = vst [vmem:[%s2172_s3] sm:$0xff] %v890_v24 }

</bundles_post_ra>
